<compile_context>
chip_gen: v5e
topology: v5e:2x2
jax: 0.10.0
libtpu: 0.0.40
codegen_flags: <defaults>
</compile_context>

<pallas_src>
import functools

import jax
import jax.numpy as jnp
from jax import lax
from jax.experimental import pallas as pl
from jax.experimental.pallas import tpu as pltpu


def _self_attn_cls_kernel(x_ref, w1_ref, b1_ref, w2_ref, b2_ref, wc_ref, bc_ref,
                          out_ref, attn_ref, *, mm_dtype=None):
    Bb, T, D = x_ref.shape
    r = w2_ref.shape[1]

    def cast(v):
        return v if mm_dtype is None else v.astype(mm_dtype)

    def mm(a, b):
        return jnp.dot(cast(a), cast(b), preferred_element_type=jnp.float32)

    x = x_ref[...]                                        # (Bb, T, D) f32
    # Merge (batch, seq) for the row-independent MLP matmuls.  Layout-free
    # when T % 8 == 0 (sublane tile); otherwise Mosaic inserts a relayout.
    x2 = x.reshape(Bb * T, D)

    # Attention MLP: Linear(D, da) -> tanh -> Linear(da, r), all rows at once.
    h = jnp.tanh(mm(x2, w1_ref[...]) + b1_ref[...])               # (Bb*T, da)
    s = (mm(h, w2_ref[...]) + b2_ref[...]).reshape(Bb, T, r)      # (Bb, T, r)

    # Put T on the lane axis: lane-dense attention store + lane-axis softmax.
    s_t = jnp.transpose(s, (0, 2, 1))                             # (Bb, r, T)
    s_max = jnp.max(s_t, axis=-1, keepdims=True)                  # (Bb, r, 1)
    e = jnp.exp(s_t - s_max)
    denom = jnp.sum(e, axis=-1, keepdims=True)
    a_t = e * pl.reciprocal(denom, approx=False)                  # (Bb, r, T)
    attn_ref[...] = a_t.astype(attn_ref.dtype)

    # Pooled features: one batched matmul over T on the MXU.
    # The classifier only uses the first 3 heads (PyTorch module semantics).
    a_used = a_t if r == 3 else a_t[:, :3, :]
    m = lax.dot_general(cast(a_used), cast(x),
                        dimension_numbers=(((2,), (1,)), ((0,), (0,))),
                        preferred_element_type=jnp.float32)       # (Bb, 3, D)
    feats = m.reshape(Bb, 3 * D)       # [m1 | m2 | m3], matches torch.cat order
    logits = mm(feats, wc_ref[...]) + bc_ref[...]                 # (Bb, tagset)
    out_ref[...] = logits.astype(out_ref.dtype)


def _derive_block_b(T, D, da, r, tagset, budget_bytes=24 << 20):
    """Largest batch tile (multiple of 8) whose working set fits the budget."""
    itemsize = 4
    per_row = itemsize * (
        2 * T * D            # double-buffered x tile
        + 2 * r * T          # double-buffered attn output tile
        + 2 * tagset         # double-buffered logits tile
        + T * da             # h
        + 3 * T * r          # s, s_t, exp
        + 3 * D + 3 * D      # pooled m + feats
    )
    cap = budget_bytes // max(per_row, 1)
    cap = max(8, (cap // 8) * 8)
    return int(min(cap, 1024))


def self_attention_classifier(x, w1, b1, w2, b2, wc, bc, *,
                              block_b=None, matmul_dtype=None):
    """x: (B, T, 2*lstm_dim) f32. Returns (logits (B, tagset), attn (B, T, r))."""
    B, T, D = x.shape
    da = w1.shape[1]
    r = w2.shape[1]
    tagset = wc.shape[1]
    if r < 3:
        raise ValueError("SelfAttentionClassifier uses the first 3 attention "
                         "heads; r must be >= 3")
    if wc.shape[0] != 3 * D:
        raise ValueError("classifier weight must have 3 * (2*lstm_dim) inputs")

    if block_b is None:
        block_b = _derive_block_b(T, D, da, r, tagset)
    block_b = max(8, (block_b // 8) * 8)

    # Batch tile: multiple of 8 (so the (Bb, tagset) logits block is tileable)
    # unless it covers the whole batch.  For B >= 16 give the "parallel" batch
    # axis at least two steps so both TensorCores are used on v7x.
    if B > block_b:
        Bb = block_b
    elif B >= 16:
        Bb = (((B + 1) // 2) + 7) // 8 * 8
    else:
        Bb = B

    b1_2d = b1.reshape(1, da)
    b2_2d = b2.reshape(1, r)
    bc_2d = bc.reshape(1, tagset)

    grid_spec = pltpu.PrefetchScalarGridSpec(
        num_scalar_prefetch=0,
        grid=(pl.cdiv(B, Bb),),
        in_specs=[
            pl.BlockSpec((Bb, T, D), lambda b: (b, 0, 0)),
            pl.BlockSpec((D, da), lambda b: (0, 0)),
            pl.BlockSpec((1, da), lambda b: (0, 0)),
            pl.BlockSpec((da, r), lambda b: (0, 0)),
            pl.BlockSpec((1, r), lambda b: (0, 0)),
            pl.BlockSpec((3 * D, tagset), lambda b: (0, 0)),
            pl.BlockSpec((1, tagset), lambda b: (0, 0)),
        ],
        out_specs=[
            pl.BlockSpec((Bb, tagset), lambda b: (b, 0)),
            pl.BlockSpec((Bb, r, T), lambda b: (b, 0, 0)),
        ],
    )

    kernel = functools.partial(_self_attn_cls_kernel, mm_dtype=matmul_dtype)

    logits, attn_rt = pl.pallas_call(
        kernel,
        out_shape=(
            jax.ShapeDtypeStruct((B, tagset), jnp.float32),
            jax.ShapeDtypeStruct((B, r, T), jnp.float32),   # lane-dense (T on lanes)
        ),
        grid_spec=grid_spec,
        compiler_params=pltpu.CompilerParams(
            dimension_semantics=("parallel",),
            vmem_limit_bytes=48 * 1024 * 1024),
    )(x, w1, b1_2d, w2, b2_2d, wc, bc_2d)

    # User-facing layout fixup in XLA: (B, r, T) -> (B, T, r).
    return logits, jnp.transpose(attn_rt, (0, 2, 1))


def _reference(x, w1, b1, w2, b2, wc, bc):
    """Plain-JAX reference mirroring the PyTorch forward."""
    s = jnp.tanh(x @ w1 + b1) @ w2 + b2               # (B, T, r)
    a = jax.nn.softmax(s, axis=1)                     # softmax over seq dim
    m1 = jnp.sum(x * a[:, :, 0:1], axis=1)
    m2 = jnp.sum(x * a[:, :, 1:2], axis=1)
    m3 = jnp.sum(x * a[:, :, 2:3], axis=1)
    feats = jnp.concatenate([m1, m2, m3], axis=1)
    return feats @ wc + bc, a


if __name__ == "__main__":
    # small shapes consistent with the module
    lstm_dim, da, r, tagset_size = 16, 32, 3, 5
    B, T, D = 2, 8, 2 * lstm_dim

    key = jax.random.PRNGKey(0)
    kx, k1, k2, k3, k4, k5, k6 = jax.random.split(key, 7)

    x = jax.random.normal(kx, (B, T, D), dtype=jnp.float32)
    # deterministic synthetic parameters (shapes match the nn.Linear layers)
    w1 = 0.1 * jax.random.normal(k1, (D, da), dtype=jnp.float32)          # Linear(lstm_dim*2, da)
    b1 = 0.1 * jax.random.normal(k2, (da,), dtype=jnp.float32)
    w2 = 0.1 * jax.random.normal(k3, (da, r), dtype=jnp.float32)          # Linear(da, r)
    b2 = 0.1 * jax.random.normal(k4, (r,), dtype=jnp.float32)
    wc = 0.1 * jax.random.normal(k5, (6 * lstm_dim, tagset_size), dtype=jnp.float32)  # Linear(lstm_dim*6, tagset)
    bc = 0.1 * jax.random.normal(k6, (tagset_size,), dtype=jnp.float32)

    logits, attn = self_attention_classifier(x, w1, b1, w2, b2, wc, bc)
    jax.block_until_ready((logits, attn))

    ref_logits, ref_attn = _reference(x, w1, b1, w2, b2, wc, bc)
    assert jnp.allclose(logits, ref_logits, atol=1e-5, rtol=1e-5)
    assert jnp.allclose(attn, ref_attn, atol=1e-5, rtol=1e-5)

    print("KERNEL_OK")
</pallas_src>

<mosaic_0001>
module attributes {stable_mosaic.version = 11 : i64} {
  func.func @_self_attn_cls_kernel(%arg0: i32, %arg1: memref<2x8x32xf32, #tpu.memory_space<vmem>>, %arg2: memref<32x32xf32, #tpu.memory_space<vmem>>, %arg3: memref<1x32xf32, #tpu.memory_space<vmem>>, %arg4: memref<32x3xf32, #tpu.memory_space<vmem>>, %arg5: memref<1x3xf32, #tpu.memory_space<vmem>>, %arg6: memref<96x5xf32, #tpu.memory_space<vmem>>, %arg7: memref<1x5xf32, #tpu.memory_space<vmem>>, %arg8: memref<2x5xf32, #tpu.memory_space<vmem>>, %arg9: memref<2x3x8xf32, #tpu.memory_space<vmem>>) attributes {dimension_semantics = [#tpu.dimension_semantics<parallel>], iteration_bounds = array<i64: 1>, scalar_prefetch = 0 : i64, scratch_operands = 0 : i64, tpu.core_type = #tpu.core_type<tc>, window_params = [{transform_indices = @transform_0, window_bounds = array<i64: 2, 8, 32>}, {pipeline_mode = #tpu.pipeline_mode<synchronous>, transform_indices = @transform_1, window_bounds = array<i64: 32, 32>}, {pipeline_mode = #tpu.pipeline_mode<synchronous>, transform_indices = @transform_2, window_bounds = array<i64: 1, 32>}, {pipeline_mode = #tpu.pipeline_mode<synchronous>, transform_indices = @transform_3, window_bounds = array<i64: 32, 3>}, {pipeline_mode = #tpu.pipeline_mode<synchronous>, transform_indices = @transform_4, window_bounds = array<i64: 1, 3>}, {pipeline_mode = #tpu.pipeline_mode<synchronous>, transform_indices = @transform_5, window_bounds = array<i64: 96, 5>}, {pipeline_mode = #tpu.pipeline_mode<synchronous>, transform_indices = @transform_6, window_bounds = array<i64: 1, 5>}, {transform_indices = @transform_7, window_bounds = array<i64: 2, 5>}, {transform_indices = @transform_8, window_bounds = array<i64: 2, 3, 8>}]} {
    %c0 = arith.constant 0 : index
    %c0_0 = arith.constant 0 : index
    %c0_1 = arith.constant 0 : index
    %0 = vector.load %arg1[%c0, %c0_0, %c0_1] : memref<2x8x32xf32, #tpu.memory_space<vmem>>, vector<2x8x32xf32>
    %1 = vector.shape_cast %0 : vector<2x8x32xf32> to vector<16x32xf32>
    %c0_2 = arith.constant 0 : index
    %c0_3 = arith.constant 0 : index
    %2 = vector.load %arg2[%c0_2, %c0_3] : memref<32x32xf32, #tpu.memory_space<vmem>>, vector<32x32xf32>
    %cst = arith.constant dense<0.000000e+00> : vector<16x32xf32>
    %3 = tpu.matmul %1, %2, %cst {dimension_numbers = #tpu.dot_dimension_numbers<[1], [0], [0], [1], [0, 0, 1, 1], [], []>} : vector<16x32xf32>, vector<32x32xf32>, vector<16x32xf32> -> vector<16x32xf32>
    %c0_4 = arith.constant 0 : index
    %c0_5 = arith.constant 0 : index
    %4 = vector.load %arg3[%c0_4, %c0_5] : memref<1x32xf32, #tpu.memory_space<vmem>>, vector<1x32xf32>
    %5 = vector.broadcast %4 : vector<1x32xf32> to vector<16x32xf32>
    %6 = arith.addf %3, %5 : vector<16x32xf32>
    %7 = math.tanh %6 : vector<16x32xf32>
    %c0_6 = arith.constant 0 : index
    %c0_7 = arith.constant 0 : index
    %8 = vector.load %arg4[%c0_6, %c0_7] : memref<32x3xf32, #tpu.memory_space<vmem>>, vector<32x3xf32>
    %cst_8 = arith.constant dense<0.000000e+00> : vector<16x3xf32>
    %9 = tpu.matmul %7, %8, %cst_8 {dimension_numbers = #tpu.dot_dimension_numbers<[1], [0], [0], [1], [0, 0, 1, 1], [], []>} : vector<16x32xf32>, vector<32x3xf32>, vector<16x3xf32> -> vector<16x3xf32>
    %c0_9 = arith.constant 0 : index
    %c0_10 = arith.constant 0 : index
    %10 = vector.load %arg5[%c0_9, %c0_10] : memref<1x3xf32, #tpu.memory_space<vmem>>, vector<1x3xf32>
    %11 = vector.broadcast %10 : vector<1x3xf32> to vector<16x3xf32>
    %12 = arith.addf %9, %11 : vector<16x3xf32>
    %13 = vector.shape_cast %12 : vector<16x3xf32> to vector<2x8x3xf32>
    %14 = tpu.transpose %13, [0, 2, 1] : vector<2x8x3xf32> -> vector<2x3x8xf32>
    %cst_11 = arith.constant dense<0xFF800000> : vector<2x3xf32>
    %15 = vector.multi_reduction <maximumf>, %14, %cst_11 [2] : vector<2x3x8xf32> to vector<2x3xf32>
    %16 = vector.shape_cast %15 : vector<2x3xf32> to vector<2x3x1xf32>
    %17 = vector.broadcast %16 : vector<2x3x1xf32> to vector<2x3x8xf32>
    %18 = arith.subf %14, %17 : vector<2x3x8xf32>
    %19 = math.exp %18 : vector<2x3x8xf32>
    %cst_12 = arith.constant dense<0.000000e+00> : vector<2x3xf32>
    %20 = vector.multi_reduction <add>, %19, %cst_12 [2] : vector<2x3x8xf32> to vector<2x3xf32>
    %21 = vector.shape_cast %20 : vector<2x3xf32> to vector<2x3x1xf32>
    %22 = tpu.reciprocal %21 : vector<2x3x1xf32> -> vector<2x3x1xf32>
    %23 = vector.broadcast %22 : vector<2x3x1xf32> to vector<2x3x8xf32>
    %24 = arith.mulf %19, %23 : vector<2x3x8xf32>
    %c0_13 = arith.constant 0 : index
    %c0_14 = arith.constant 0 : index
    %c0_15 = arith.constant 0 : index
    %25 = vector.load %arg9[%c0_13, %c0_14, %c0_15] : memref<2x3x8xf32, #tpu.memory_space<vmem>>, vector<2x3x8xf32>
    tpu.vector_store %arg9[%c0_13, %c0_14, %c0_15], %24 {strides = array<i32>} : memref<2x3x8xf32, #tpu.memory_space<vmem>>, vector<2x3x8xf32>,
    %cst_16 = arith.constant dense<0.000000e+00> : vector<2x3x32xf32>
    %26 = tpu.matmul %24, %0, %cst_16 {dimension_numbers = #tpu.dot_dimension_numbers<[2], [1], [1], [2], [0, 0, 0, 1, 1, 2], [0], [0]>} : vector<2x3x8xf32>, vector<2x8x32xf32>, vector<2x3x32xf32> -> vector<2x3x32xf32>
    %27 = vector.shape_cast %26 : vector<2x3x32xf32> to vector<2x96xf32>
    %c0_17 = arith.constant 0 : index
    %c0_18 = arith.constant 0 : index
    %28 = vector.load %arg6[%c0_17, %c0_18] : memref<96x5xf32, #tpu.memory_space<vmem>>, vector<96x5xf32>
    %cst_19 = arith.constant dense<0.000000e+00> : vector<2x5xf32>
    %29 = tpu.matmul %27, %28, %cst_19 {dimension_numbers = #tpu.dot_dimension_numbers<[1], [0], [0], [1], [0, 0, 1, 1], [], []>} : vector<2x96xf32>, vector<96x5xf32>, vector<2x5xf32> -> vector<2x5xf32>
    %c0_20 = arith.constant 0 : index
    %c0_21 = arith.constant 0 : index
    %30 = vector.load %arg7[%c0_20, %c0_21] : memref<1x5xf32, #tpu.memory_space<vmem>>, vector<1x5xf32>
    %31 = vector.broadcast %30 : vector<1x5xf32> to vector<2x5xf32>
    %32 = arith.addf %29, %31 : vector<2x5xf32>
    %c0_22 = arith.constant 0 : index
    %c0_23 = arith.constant 0 : index
    %33 = vector.load %arg8[%c0_22, %c0_23] : memref<2x5xf32, #tpu.memory_space<vmem>>, vector<2x5xf32>
    tpu.vector_store %arg8[%c0_22, %c0_23], %32 {strides = array<i32>} : memref<2x5xf32, #tpu.memory_space<vmem>>, vector<2x5xf32>,
    return
  }
  func.func @transform_0(%arg0: i32) -> (i32, i32, i32) {
    %c0_i32 = arith.constant 0 : i32
    %c0_i32_0 = arith.constant 0 : i32
    %c0_i32_1 = arith.constant 0 : i32
    return %arg0, %c0_i32, %c0_i32_0 : i32, i32, i32
  }
  func.func @transform_1(%arg0: i32) -> (i32, i32) {
    %c0_i32 = arith.constant 0 : i32
    %c0_i32_0 = arith.constant 0 : i32
    %c0_i32_1 = arith.constant 0 : i32
    return %c0_i32, %c0_i32_0 : i32, i32
  }
  func.func @transform_2(%arg0: i32) -> (i32, i32) {
    %c0_i32 = arith.constant 0 : i32
    %c0_i32_0 = arith.constant 0 : i32
    %c0_i32_1 = arith.constant 0 : i32
    return %c0_i32, %c0_i32_0 : i32, i32
  }
  func.func @transform_3(%arg0: i32) -> (i32, i32) {
    %c0_i32 = arith.constant 0 : i32
    %c0_i32_0 = arith.constant 0 : i32
    %c0_i32_1 = arith.constant 0 : i32
    return %c0_i32, %c0_i32_0 : i32, i32
  }
  func.func @transform_4(%arg0: i32) -> (i32, i32) {
    %c0_i32 = arith.constant 0 : i32
    %c0_i32_0 = arith.constant 0 : i32
    %c0_i32_1 = arith.constant 0 : i32
    return %c0_i32, %c0_i32_0 : i32, i32
  }
  func.func @transform_5(%arg0: i32) -> (i32, i32) {
    %c0_i32 = arith.constant 0 : i32
    %c0_i32_0 = arith.constant 0 : i32
    %c0_i32_1 = arith.constant 0 : i32
    return %c0_i32, %c0_i32_0 : i32, i32
  }
  func.func @transform_6(%arg0: i32) -> (i32, i32) {
    %c0_i32 = arith.constant 0 : i32
    %c0_i32_0 = arith.constant 0 : i32
    %c0_i32_1 = arith.constant 0 : i32
    return %c0_i32, %c0_i32_0 : i32, i32
  }
  func.func @transform_7(%arg0: i32) -> (i32, i32) {
    %c0_i32 = arith.constant 0 : i32
    %c0_i32_0 = arith.constant 0 : i32
    return %arg0, %c0_i32 : i32, i32
  }
  func.func @transform_8(%arg0: i32) -> (i32, i32, i32) {
    %c0_i32 = arith.constant 0 : i32
    %c0_i32_0 = arith.constant 0 : i32
    %c0_i32_1 = arith.constant 0 : i32
    return %arg0, %c0_i32, %c0_i32_0 : i32, i32, i32
  }
}

</mosaic_0001>

<bundles_post_ra>
// kernel: tpu_custom_call.1
= control target key start
LH: loop header
LB: loop body
LE: loop exit
PB: predicated region body
PF: predicated region fallthrough
CT: control target
= control target key end

     0   :  { %s567_s0 = inlined_call_operand.vmem [shape: f32[2,8,32], index: 0, kind: input, shape index: {}]   ;;  %s568_s1 = inlined_call_operand.vmem [shape: f32[32,32], index: 1, kind: input, shape index: {}]   ;;  %s569_s2 = inlined_call_operand.vmem [shape: f32[1,32], index: 2, kind: input, shape index: {}]   ;;  %s570_s3 = inlined_call_operand.vmem [shape: f32[32,3], index: 3, kind: input, shape index: {}]   ;;  %s571_s4 = inlined_call_operand.vmem [shape: f32[1,3], index: 4, kind: input, shape index: {}]   ;;  %s572_s5 = inlined_call_operand.vmem [shape: f32[96,5], index: 5, kind: input, shape index: {}]   ;;  %s573_s6 = inlined_call_operand.vmem [shape: f32[1,5], index: 6, kind: input, shape index: {}]   ;;  %s574_s7 = inlined_call_operand.hbm [shape: f32[2,5], index: 7, kind: output, shape index: {0}]   ;;  %s575_s8 = inlined_call_operand.vmem [shape: f32[2,3,8], index: 8, kind: output, shape index: {1}]  }
   0x1   :  { %v34_v0 = vld [vmem:[%s568_s1 + $0x18] sm:$0xff]  ;;  %v33_v1 = vld [vmem:[%s568_s1 + $0x10] sm:$0xff]  ;;  %v32_v2 = vld [vmem:[%s568_s1 + $0x8] sm:$0xff] }
   0x2   :  { %58 = vmatpush.msra.mxu0 %v34_v0  ;;  %v29_v3 = vld [vmem:[%s567_s0] sm:$0xff]  ;;  %v30_v4 = vld [vmem:[%s567_s0 + $0x8] sm:$0xff] }
   0x3   :  { %242 = vmatpush.msra.mxu3 %v29_v3 }
   0x4   :  { %59 = vmatpush.msra.mxu0 %v33_v1 }
   0x5   :  { %265 = vmatpush.msrb.mxu3 %v30_v4 }
   0x6   :  { %14 = vsyncpa [#allocation3], 0  ;;  %v31_v5 = vld [vmem:[%s568_s1] sm:$0xff]  ;;  %60 = vmatpush.msra.mxu0 %v32_v2  ;;  %vm39_vm0 = vcmask 261120   ;;  %v74_v6 = vld [vmem:[%s570_s3 + $0x18] sm:$0xff]  ;;  %vm172_vm1 = vcmask 59392  }
   0x7   :  { %97 = vmatpush.msra.mxu1 %v74_v6  ;;  %v73_v7 = vld [vmem:[%s570_s3 + $0x10] sm:$0xff]  ;;  %v72_v8 = vld [vmem:[%s570_s3 + $0x8] sm:$0xff]  ;;  %v71_v9 = vld [vmem:[%s570_s3] sm:$0xff]  ;;  %vm223_vm6 = vcmask 64512   ;;  %v420_v2 = vmov 1983009808  }
   0x8   :  { %61 = vmatpush.msra.mxu0 %v31_v5  ;;  %v379_v10 = vld [vmem:[%s569_s2] ss:$0 sm:$0xff]  ;;  %v315_v60 = vld [vmem:[%s572_s5 + $0x58] sm:$0xff]  ;;  %v314_v61 = vld [vmem:[%s572_s5 + $0x50] sm:$0xff]  ;;  %vm279_vm11 = vcmask 1047556   ;;  %s422_s20 = smov 64  }
   0x9   :  { %366 = vmatmul.msk.f32.vlgmr.msra.gmra.mxu0 %vm39_vm0, %v29_v3  ;;  %98 = vmatpush.msra.mxu1 %v73_v7  ;;  %v380_v17 = vld [vmem:[%s571_s4] ss:$0 sm:$0xff]  ;;  %v313_v62 = vld [vmem:[%s572_s5 + $0x48] sm:$0xff]  ;;  %v311_v0 = vld [vmem:[%s572_s5 + $0x38] sm:$0xff]  ;;  %v271_v3 = vunpack.c.l.s4 %v420_v2  ;;  %s423_s21 = smov 32   ;;  %vm302_vm12 = vcmask 523264  }
   0xa   :  { %328 = vmatpush.msra.mxu2 %v315_v60  ;;  %v312_v63 = vld [vmem:[%s572_s5 + $0x40] sm:$0xff]  ;;  %v310_v1 = vld [vmem:[%s572_s5 + $0x30] sm:$0xff]  ;;  %vm320_vm13 = vcmask 785408   ;;  %s424_s28 = smov [#allocation2]   ;;  %s353_s10 = sshll.u32 %s574_s7, 4  ;;  %vm344_vm14 = vcmask 33792   ;;  %s354_s10 = int_to_ptr.hbm [resolvable:$true] %s353_s10 }
   0xb   :  { %99 = vmatpush.msra.mxu1 %v72_v8  ;;  %v308_v5 = vld [vmem:[%s572_s5 + $0x20] sm:$0xff]  ;;  %v272_v7 = vunpack.c.0.s8 %v271_v3  ;;  %v421_v8 = vmov 1934713408   ;;  %s351_s29 = sshll.u32 %s424_s28, 4  ;;  %s352_s29 = int_to_ptr.vmem [resolvable:$true] %s351_s29 }
   0xc   :  { %329 = vmatpush.msra.mxu2 %v314_v61 }
   0xd   :  { %100 = vmatpush.msra.mxu1 %v71_v9  ;;  %v284_v9 = vunpack.c.l.s4 %v421_v8 }
   0xe   :  { %330 = vmatpush.msra.mxu2 %v313_v62 }
  0x10   :  { %331 = vmatpush.msra.mxu2 %v312_v63 }
  0x11   :  { %367 = vmatmul.msk.f32.gmra.mxu0 %vm39_vm0, %v30_v4  ;;  %v309_v4 = vld [vmem:[%s572_s5 + $0x28] sm:$0xff] }
  0x12   :  { %332 = vmatpush.msra.mxu2 %v311_v0 }
  0x14   :  { %333 = vmatpush.msra.mxu2 %v310_v1 }
  0x16   :  { %334 = vmatpush.msra.mxu2 %v309_v4 }
  0x18   :  { %335 = vmatpush.msra.mxu2 %v308_v5 }
  0x86   :  { %v63_v11 = vpop.f32.mrf.mxu0 }
  0x87   :  { %v64_v12 = vadd.f32 %v379_v10, %v63_v11 }
  0x89   :  { %382 = vtanh.f32 %v64_v12  ;;  %v285_v12 = vunpack.c.0.s8 %v284_v9 }
  0x8e   :  { %v66_v13 = vpop.f32.mrf.mxu0 }
  0x8f   :  { %v383_v14 = vpop.eup %382  ;;  %v67_v15 = vadd.f32 %v379_v10, %v66_v13 }
  0x90   :  { %368 = vmatmul.msk.f32.vlgmr.msra.gmra.mxu1 %vm39_vm0, %v383_v14 }
  0x91   :  { %384 = vtanh.f32 %v67_v15 }
  0x97   :  { %v385_v16 = vpop.eup %384 }
  0x98   :  { %369 = vmatmul.msk.f32.gmra.mxu1 %vm39_vm0, %v385_v16 }
 0x10d   :  { %v102_v18 = vpop.f32.mrf.mxu1 }
 0x10e   :  { %v103_v19 = vadd.f32 %v380_v17, %v102_v18 }
 0x110   :  { %108 = vxpose.xlu0.b32.start.end [1/1] (short) (narrow) %v103_v19, 8 }
 0x115   :  { %v105_v20 = vpop.f32.mrf.mxu1 }
 0x116   :  { %v106_v21 = vadd.f32 %v380_v17, %v105_v20 }
 0x118   :  { %140 = vxpose.xlu0.b32.start.end [1/1] (short) (narrow) %v106_v21, 8 }
 0x1b4   :  { %v124_v22 = vpop.trf.xlu0 }
 0x1b5   :  { %v173_v23 = vsel %vm172_vm1, %v124_v22, -inf }
 0x1b6   :  { %174 = vmax.xlane.f32.xlu1 %v173_v23  ;;  %v306_v23 = vld [vmem:[%s572_s5 + $0x10] sm:$0xff] }
 0x1bc   :  { %v156_v24 = vpop.trf.xlu0 }
 0x1bd   :  { %v176_v25 = vsel %vm172_vm1, %v156_v24, -inf }
 0x1be   :  { %177 = vmax.xlane.f32.xlu1 %v176_v25  ;;  %v304_v25 = vld [vmem:[%s572_s5] sm:$0xff] }
 0x229   :  { %v175_v26 = vpop.xlane.xlu1 %174 }
 0x22a   :  { %v179_v27 = vsub.f32 %v124_v22, %v175_v26  ;;  %v307_v22 = vld [vmem:[%s572_s5 + $0x18] sm:$0xff] }
 0x22b   :  { %336 = vmatpush.msra.mxu2 %v307_v22 }
 0x22c   :  { %v181_v28 = vmul.f32 1.442695, %v179_v27 }
 0x22d   :  { %337 = vmatpush.msra.mxu2 %v306_v23 }
 0x22e   :  { %386 = vpow2.f32 %v181_v28 }
 0x231   :  { %v178_v29 = vpop.xlane.xlu1 %177 }
 0x232   :  { %v180_v30 = vsub.f32 %v156_v24, %v178_v29  ;;  %v305_v24 = vld [vmem:[%s572_s5 + $0x8] sm:$0xff] }
 0x233   :  { %338 = vmatpush.msra.mxu2 %v305_v24 }
 0x234   :  { %v387_v31 = vpop.eup %386  ;;  %v183_v32 = vmul.f32 1.442695, %v180_v30  ;;  %v381_v30 = vld [vmem:[%s573_s6] ss:$0 sm:$0xff] }
 0x235   :  { %v185_v33 = vsel %vm172_vm1, %v387_v31, 0.0  ;;  %339 = vmatpush.msra.mxu2 %v304_v25 }
 0x236   :  { %388 = vpow2.f32 %v183_v32  ;;  %186 = vadd.xlane.f32.xlu2 %v185_v33 }
 0x23c   :  { %v389_v34 = vpop.eup %388 }
 0x23d   :  { %v188_v35 = vsel %vm172_vm1, %v389_v34, 0.0 }
 0x23e   :  { %189 = vadd.xlane.f32.xlu2 %v188_v35 }
 0x2a9   :  { %v187_v36 = vpop.xlane.xlu2 %186 }
 0x2aa   :  { %390 = vrcp.f32 %v187_v36  ;;  %v202_v41 = vand.u32 2147483648, %v187_v36  ;;  %v200_v43 = vand.u32 2147483647, %v187_v36  ;;  %vm196_vm3 = vweird.f32 %v187_v36 }
 0x2ac   :  { %v203_v46 = vor.u32 1.1754944e-38, %v202_v41  ;;  %vm201_vm5 = vcmp.eq.f32.partialorder %v200_v43, 8.507059e+37 }
 0x2b0   :  { %v391_v37 = vpop.eup %390 }
 0x2b1   :  { %v192_v38 = vmul.f32 %v391_v37, %v187_v36  ;;  %v190_v39 = vpop.xlane.xlu2 %189  ;;  %vm197_vm2 = vweird.f32 %v391_v37 }
 0x2b2   :  { %392 = vrcp.f32 %v190_v39  ;;  %vm198_vm4 = vmor %vm196_vm3, %vm197_vm2  ;;  %v216_v52 = vand.u32 2147483648, %v190_v39  ;;  %v214_v54 = vand.u32 2147483647, %v190_v39  ;;  %vm210_vm8 = vweird.f32 %v190_v39 }
 0x2b3   :  { %v193_v40 = vsub.f32 1.0, %v192_v38 }
 0x2b4   :  { %v217_v56 = vor.u32 1.1754944e-38, %v216_v52  ;;  %vm215_vm10 = vcmp.eq.f32.partialorder %v214_v54, 8.507059e+37 }
 0x2b5   :  { %v194_v42 = vmul.f32 %v391_v37, %v193_v40 }
 0x2b7   :  { %v195_v44 = vadd.f32 %v391_v37, %v194_v42 }
 0x2b8   :  { %v393_v45 = vpop.eup %392 }
 0x2b9   :  { %v206_v47 = vmul.f32 %v393_v45, %v190_v39  ;;  %v199_v48 = vsel %vm198_vm4, %v391_v37, %v195_v44  ;;  %vm211_vm7 = vweird.f32 %v393_v45 }
 0x2ba   :  { %v204_v49 = vsel %vm201_vm5, %v203_v46, %v199_v48  ;;  %vm212_vm9 = vmor %vm210_vm8, %vm211_vm7 }
 0x2bb   :  { %v207_v50 = vsub.f32 1.0, %v206_v47  ;;  %v219_v51 = vmul.f32 %v387_v31, %v204_v49 }
 0x2bd   :  { %v208_v53 = vmul.f32 %v393_v45, %v207_v50  ;;  %221 = vst.msk [vmem:[%s575_s8] sm:$0x7] %vm172_vm1, %v219_v51  ;;  %370 = vmatmul.msk.f32.vlgmr.msra.gmra.mxu3 %vm223_vm6, %v219_v51 }
 0x2bf   :  { %v209_v55 = vadd.f32 %v393_v45, %v208_v53 }
 0x2c1   :  { %v213_v57 = vsel %vm212_vm9, %v393_v45, %v209_v55 }
 0x2c2   :  { %v218_v58 = vsel %vm215_vm10, %v217_v56, %v213_v57 }
 0x2c3   :  { %v220_v59 = vmul.f32 %v389_v34, %v218_v58 }
 0x2c5   :  { %222 = vst.msk [vmem:[%s575_s8 + $0x4] sm:$0x7] %vm172_vm1, %v220_v59  ;;  %371 = vmatmul.msk.f32.vlgmr.msrb.gmra.mxu3 %vm223_vm6, %v220_v59 }
 0x340   :  { %v244_v6 = vpop.f32.mrf.mxu3 }
 0x341   :  { %v273_v10 = vperm.slane %v244_v6, %v272_v7 }
 0x343   :  { %v281_v13 = vrot.slane %v273_v10, 4 }
 0x348   :  { %v267_v11 = vpop.f32.mrf.mxu3 }
 0x349   :  { %v277_v14 = vperm.slane %v267_v11, %v272_v7 }
 0x34b   :  { %v278_v15 = vrot.slane %v277_v14, 4  ;;  %v282_v16 = vsel %vm279_vm11, %v277_v14, %v281_v13 }
 0x34c   :  { %v292_v17 = vperm.slane %v282_v16, %v285_v12 }
 0x34d   :  { %v280_v18 = vsel %vm279_vm11, %v278_v15, %v273_v10 }
 0x34e   :  { %298 = vrot.lane.b32.xlu1 %v292_v17, %s422_s20  ;;  %v286_v19 = vperm.slane %v280_v18, %v285_v12 }
 0x350   :  { %v287_v20 = vrot.slane %v286_v19, 4 }
 0x352   :  { %v288_v21 = vsel %vm279_vm11, 0.0, %v287_v20 }
 0x353   :  { %294 = vrot.lane.b32.xlu0 %v288_v21, %s423_s21 }
 0x3c0   :  { %v299_v27 = vpop.permute.xlu1 %298 }
 0x3c5   :  { %v295_v26 = vpop.permute.xlu0 %294 }
 0x3c6   :  { %v301_v28 = vsel %vm39_vm0, %v286_v19, %v295_v26 }
 0x3c7   :  { %v303_v29 = vsel %vm302_vm12, %v301_v28, %v299_v27 }
 0x3c8   :  { %372 = vmatmul.msk.f32.vlgmr.msra.gmra.mxu2 %vm320_vm13, %v303_v29 }
 0x44b   :  { %v341_v31 = vpop.f32.mrf.mxu2 }
 0x44c   :  { %v342_v32 = vadd.f32 %v381_v30, %v341_v31 }
 0x44e   :  { %345 = vst.msk [vmem:[#allocation2] sm:$0x3] %vm344_vm14, %v342_v32 }
 0x44f   :  { %356 = dma.vmem_to_hbm [thread:$0]  %s352_s29, 32, %s354_s10, [#allocation3]  }
 0x450   :  { %418 = dma.done.wait [#allocation3], 32  }
 0x451   :  { %419 = vsyncadd [#allocation3], 4294967264 }
 0x452   :  { %365 = vsyncpa [#allocation3], 1 }

</bundles_post_ra>
